<compile_context>
chip_gen: v7x
topology: tpu7x:2x2x1
jax: 0.10.0
libtpu: 0.0.40
codegen_flags: <defaults>
</compile_context>

<pallas_src>
import functools

import jax
import jax.numpy as jnp
from jax.experimental import pallas as pl
from jax.experimental.pallas import tpu as pltpu

# Matmul operand dtype (accumulation is always f32).  Set to jnp.float32 for bit-closer numerics.
MXU_DTYPE = jnp.bfloat16
LN_EPS = 1e-6  # torchvision ViT uses LayerNorm(eps=1e-6)


# ----------------------------------------------------------------------------
# In-kernel helpers (operate on values, not refs)
# ----------------------------------------------------------------------------
def _mm(a, w):
    """a:(M,K) @ w:(K,N) -> f32 (M,N), bf16 MXU operands, f32 accumulate."""
    return jnp.dot(a.astype(MXU_DTYPE), w.astype(MXU_DTYPE),
                   preferred_element_type=jnp.float32)


def _mm_nt(a, b):
    """a:(M,K) x b:(N,K) contracting K -> f32 (M,N)  (q @ k^T without explicit transpose)."""
    return jax.lax.dot_general(a.astype(MXU_DTYPE), b.astype(MXU_DTYPE),
                               (((1,), (1,)), ((), ())),
                               preferred_element_type=jnp.float32)


def _layernorm(x, g, b, eps):
    """LayerNorm over the last dim, f32 math.  x:(M,D)  g,b:(1,D)."""
    x = x.astype(jnp.float32)
    mean = jnp.mean(x, axis=-1, keepdims=True)
    var = jnp.mean(jnp.square(x - mean), axis=-1, keepdims=True)
    return (x - mean) * jax.lax.rsqrt(var + eps) * g + b


# ----------------------------------------------------------------------------
# Fused kernels
# ----------------------------------------------------------------------------
def _embed_kernel(patches_ref, w_ref, b_ref, cls_ref, pos_ref, o_ref):
    """Patch-embed matmul + cls token + pos-embed for ONE batch element.

    patches:(Np, C*P*P)  w:(C*P*P, D)  b,cls:(1, D)  pos:(S, D)  o:(S, D)
    """
    s = o_ref.shape[0]
    emb = _mm(patches_ref[...], w_ref[...]) + b_ref[...]                       # (Np, D)
    cls = cls_ref[...].astype(jnp.float32)                                     # (1, D)
    o_ref[pl.ds(0, 1), :] = (cls + pos_ref[pl.ds(0, 1), :]).astype(o_ref.dtype)
    o_ref[pl.ds(1, s - 1), :] = (emb + pos_ref[pl.ds(1, s - 1), :]).astype(o_ref.dtype)


def _block_kernel(x_ref, ln1_g, ln1_b, qkv_w, qkv_b, out_w, out_b,
                  ln2_g, ln2_b, mlp1_w, mlp1_b, mlp2_w, mlp2_b, o_ref,
                  *, heads, eps):
    """One fused pre-norm transformer encoder block for ONE batch element.  x:(S, D)."""
    x = x_ref[...].astype(jnp.float32)                                          # (S, D)
    seq, d = x.shape
    dh = d // heads
    scale = 1.0 / (dh ** 0.5)

    # --- attention sub-block (pre-norm) -------------------------------------
    h = _layernorm(x, ln1_g[...], ln1_b[...], eps)
    qkv = _mm(h, qkv_w[...]) + qkv_b[...]                                       # (S, 3D)
    q = qkv[:, 0:d]
    k = qkv[:, d:2 * d]
    v = qkv[:, 2 * d:3 * d]

    head_outs = []
    for hd in range(heads):                                                     # static unroll
        lo, hi = hd * dh, (hd + 1) * dh
        qh, kh, vh = q[:, lo:hi], k[:, lo:hi], v[:, lo:hi]                      # (S, dh)
        s = _mm_nt(qh, kh) * scale                                              # (S, S)
        s = s - jnp.max(s, axis=-1, keepdims=True)
        p = jnp.exp(s)
        p = p * pl.reciprocal(jnp.sum(p, axis=-1, keepdims=True), approx=True)
        head_outs.append(_mm(p, vh))                                            # (S, dh)
    attn = jnp.concatenate(head_outs, axis=-1)                                  # (S, D)

    x = x + _mm(attn, out_w[...]) + out_b[...]                                  # residual 1

    # --- MLP sub-block (pre-norm) -------------------------------------------
    h = _layernorm(x, ln2_g[...], ln2_b[...], eps)
    # TODO(synk): torch nn.GELU default is the exact erf form; tanh approximation used here for
    # robust Mosaic lowering (difference < 1e-3).
    h = jax.nn.gelu(_mm(h, mlp1_w[...]) + mlp1_b[...], approximate=True)        # (S, F)
    x = x + _mm(h, mlp2_w[...]) + mlp2_b[...]                                   # residual 2

    o_ref[...] = x.astype(o_ref.dtype)


def _tail_kernel(x_ref, lnf_g, lnf_b, head_w, head_b, p1_w, p1_b, p2_w, p2_b, o_ref, *, eps):
    """final LN -> classification head -> proj Linear -> ReLU -> Linear.  x:(B, D)."""
    h = _layernorm(x_ref[...], lnf_g[...], lnf_b[...], eps)
    logits = _mm(h, head_w[...]) + head_b[...]                                  # (B, num_classes)
    z = jnp.maximum(_mm(logits, p1_w[...]) + p1_b[...], 0.0)                    # (B, proj_hidden)
    z = _mm(z, p2_w[...]) + p2_b[...]                                           # (B, proj_out)
    o_ref[...] = z.astype(o_ref.dtype)


# ----------------------------------------------------------------------------
# pallas_call wrappers
# ----------------------------------------------------------------------------
def _const_spec(shape):
    n = len(shape)
    return pl.BlockSpec(shape, lambda i, _n=n: (0,) * _n)


def embed(patches, w, b, cls_tok, pos):
    bsz, n_patches, cpp = patches.shape
    seq, d = pos.shape
    return pl.pallas_call(
        _embed_kernel,
        grid=(bsz,),
        out_shape=jax.ShapeDtypeStruct((bsz, seq, d), jnp.float32),
        in_specs=[
            pl.BlockSpec((None, n_patches, cpp), lambda i: (i, 0, 0)),
            _const_spec((cpp, d)),
            _const_spec((1, d)),
            _const_spec((1, d)),
            _const_spec((seq, d)),
        ],
        out_specs=pl.BlockSpec((None, seq, d), lambda i: (i, 0, 0)),
        compiler_params=pltpu.CompilerParams(dimension_semantics=("parallel",)),
    )(patches, w, b.reshape(1, d), cls_tok, pos)


def transformer_block(x, blk, heads, eps=LN_EPS):
    bsz, seq, d = x.shape
    f = blk["mlp1_w"].shape[1]
    kern = functools.partial(_block_kernel, heads=heads, eps=eps)
    return pl.pallas_call(
        kern,
        grid=(bsz,),
        out_shape=jax.ShapeDtypeStruct((bsz, seq, d), jnp.float32),
        in_specs=[
            pl.BlockSpec((None, seq, d), lambda i: (i, 0, 0)),
            _const_spec((1, d)), _const_spec((1, d)),
            _const_spec((d, 3 * d)), _const_spec((1, 3 * d)),
            _const_spec((d, d)), _const_spec((1, d)),
            _const_spec((1, d)), _const_spec((1, d)),
            _const_spec((d, f)), _const_spec((1, f)),
            _const_spec((f, d)), _const_spec((1, d)),
        ],
        out_specs=pl.BlockSpec((None, seq, d), lambda i: (i, 0, 0)),
        compiler_params=pltpu.CompilerParams(dimension_semantics=("parallel",)),
    )(x,
      blk["ln1_g"].reshape(1, d), blk["ln1_b"].reshape(1, d),
      blk["qkv_w"], blk["qkv_b"].reshape(1, 3 * d),
      blk["out_w"], blk["out_b"].reshape(1, d),
      blk["ln2_g"].reshape(1, d), blk["ln2_b"].reshape(1, d),
      blk["mlp1_w"], blk["mlp1_b"].reshape(1, f),
      blk["mlp2_w"], blk["mlp2_b"].reshape(1, d))


def tail(cls_tokens, params, eps=LN_EPS):
    bsz, d = cls_tokens.shape
    c = params["head_w"].shape[1]
    ph = params["proj1_w"].shape[1]
    po = params["proj2_w"].shape[1]
    return pl.pallas_call(
        functools.partial(_tail_kernel, eps=eps),
        grid=(1,),
        out_shape=jax.ShapeDtypeStruct((bsz, po), jnp.float32),
        in_specs=[
            _const_spec((bsz, d)),
            _const_spec((1, d)), _const_spec((1, d)),
            _const_spec((d, c)), _const_spec((1, c)),
            _const_spec((c, ph)), _const_spec((1, ph)),
            _const_spec((ph, po)), _const_spec((1, po)),
        ],
        out_specs=_const_spec((bsz, po)),
        compiler_params=pltpu.CompilerParams(dimension_semantics=("arbitrary",)),
    )(cls_tokens,
      params["ln_f_g"].reshape(1, d), params["ln_f_b"].reshape(1, d),
      params["head_w"], params["head_b"].reshape(1, c),
      params["proj1_w"], params["proj1_b"].reshape(1, ph),
      params["proj2_w"], params["proj2_b"].reshape(1, po))


# ----------------------------------------------------------------------------
# Small ViT config (stands in for ViT-B/16: patch conv, cls token, pos-embed,
# pre-norm transformer blocks, final LN, classification head) + projection MLP.
# Chosen lane-friendly: hidden = 128 so the residual stream is lane-dense.
# ----------------------------------------------------------------------------
CFG = dict(
    img=32, patch=16, in_ch=3,        # 2x2 = 4 patches -> seq = 5 with cls token
    hidden=128, heads=4, mlp=256, layers=2,
    num_classes=128,                  # stands in for the 1000-way ImageNet head
    proj_hidden=128, proj_out=64,     # nn.Linear(1000,h) -> ReLU -> nn.Linear(h,o)
)


def init_params(key, cfg):
    d, p, c = cfg["hidden"], cfg["patch"], cfg["in_ch"]
    n_patches = (cfg["img"] // p) ** 2
    seq = n_patches + 1
    keys = iter(jax.random.split(key, 64))

    def w(shape):
        return jax.random.normal(next(keys), shape, jnp.float32) * 0.02

    # NOTE: to load real Conv2d patch weights, flatten the (D, C, P, P) conv kernel as
    # weight.reshape(D, C*P*P).T — (c, ph, pw) order matches the patchify below.
    params = dict(
        patch_w=w((c * p * p, d)), patch_b=jnp.zeros((d,), jnp.float32),
        cls_token=w((1, d)),
        pos_embed=w((seq, d)),
        blocks=[],
        ln_f_g=jnp.ones((d,), jnp.float32), ln_f_b=jnp.zeros((d,), jnp.float32),
        head_w=w((d, cfg["num_classes"])), head_b=jnp.zeros((cfg["num_classes"],), jnp.float32),
        proj1_w=w((cfg["num_classes"], cfg["proj_hidden"])),
        proj1_b=jnp.zeros((cfg["proj_hidden"],), jnp.float32),
        proj2_w=w((cfg["proj_hidden"], cfg["proj_out"])),
        proj2_b=jnp.zeros((cfg["proj_out"],), jnp.float32),
    )
    for _ in range(cfg["layers"]):
        params["blocks"].append(dict(
            ln1_g=jnp.ones((d,), jnp.float32), ln1_b=jnp.zeros((d,), jnp.float32),
            qkv_w=w((d, 3 * d)), qkv_b=jnp.zeros((3 * d,), jnp.float32),
            out_w=w((d, d)), out_b=jnp.zeros((d,), jnp.float32),
            ln2_g=jnp.ones((d,), jnp.float32), ln2_b=jnp.zeros((d,), jnp.float32),
            mlp1_w=w((d, cfg["mlp"])), mlp1_b=jnp.zeros((cfg["mlp"],), jnp.float32),
            mlp2_w=w((cfg["mlp"], d)), mlp2_b=jnp.zeros((d,), jnp.float32),
        ))
    return params


def vit_contrastive_forward(params, x, cfg):
    """x: (B, C, H, W) NCHW -> (B, proj_out)."""
    b, c, hh, ww = x.shape
    p, nheads = cfg["patch"], cfg["heads"]
    nh, nw = hh // p, ww // p
    n_patches = nh * nw

    # patchify (pure data movement): Conv2d(C, D, kernel=P, stride=P) == patchify + matmul
    patches = (x.reshape(b, c, nh, p, nw, p)
                 .transpose(0, 2, 4, 1, 3, 5)
                 .reshape(b, n_patches, c * p * p))

    # patch embedding + cls token + positional embedding (fused, gridded over batch)
    tok = embed(patches, params["patch_w"], params["patch_b"],
                params["cls_token"], params["pos_embed"])             # (B, S, D)

    # pre-norm transformer encoder blocks, one fused kernel per block
    for blk in params["blocks"]:
        tok = transformer_block(tok, blk, nheads)

    # class-token readout (cheap JAX slice) -> fused final-LN/head/projection kernel
    cls_out = tok[:, 0, :]                                            # (B, D)
    return tail(cls_out, params)                                      # (B, proj_out)


if __name__ == "__main__":
    key = jax.random.PRNGKey(0)
    x = jax.random.normal(key, (2, CFG["in_ch"], CFG["img"], CFG["img"]), jnp.float32)
    params = init_params(jax.random.PRNGKey(1), CFG)

    out = vit_contrastive_forward(params, x, CFG)
    jax.block_until_ready(out)
    assert out.shape == (2, CFG["proj_out"]) and out.dtype == jnp.float32
    print("KERNEL_OK")
</pallas_src>

<mosaic_0001>
module attributes {stable_mosaic.version = 11 : i64} {
  func.func @_embed_kernel(%arg0: i32, %arg1: memref<1x4x768xf32, #tpu.memory_space<vmem>>, %arg2: memref<768x128xf32, #tpu.memory_space<vmem>>, %arg3: memref<1x128xf32, #tpu.memory_space<vmem>>, %arg4: memref<1x128xf32, #tpu.memory_space<vmem>>, %arg5: memref<5x128xf32, #tpu.memory_space<vmem>>, %arg6: memref<1x5x128xf32, #tpu.memory_space<vmem>>) attributes {dimension_semantics = [#tpu.dimension_semantics<parallel>], iteration_bounds = array<i64: 2>, scalar_prefetch = 0 : i64, scratch_operands = 0 : i64, tpu.core_type = #tpu.core_type<tc>, window_params = [{transform_indices = @transform_0, window_bounds = array<i64: 1, 4, 768>}, {pipeline_mode = #tpu.pipeline_mode<synchronous>, transform_indices = @transform_1, window_bounds = array<i64: 768, 128>}, {pipeline_mode = #tpu.pipeline_mode<synchronous>, transform_indices = @transform_2, window_bounds = array<i64: 1, 128>}, {pipeline_mode = #tpu.pipeline_mode<synchronous>, transform_indices = @transform_3, window_bounds = array<i64: 1, 128>}, {pipeline_mode = #tpu.pipeline_mode<synchronous>, transform_indices = @transform_4, window_bounds = array<i64: 5, 128>}, {transform_indices = @transform_5, window_bounds = array<i64: 1, 5, 128>}]} {
    %c0 = arith.constant 0 : index
    %c0_0 = arith.constant 0 : index
    %c0_1 = arith.constant 0 : index
    %0 = vector.load %arg1[%c0, %c0_0, %c0_1] : memref<1x4x768xf32, #tpu.memory_space<vmem>>, vector<1x4x768xf32>
    %1 = vector.shape_cast %0 : vector<1x4x768xf32> to vector<4x768xf32>
    %c0_2 = arith.constant 0 : index
    %c0_3 = arith.constant 0 : index
    %2 = vector.load %arg2[%c0_2, %c0_3] : memref<768x128xf32, #tpu.memory_space<vmem>>, vector<768x128xf32>
    %3 = arith.truncf %1 : vector<4x768xf32> to vector<4x768xbf16>
    %4 = arith.truncf %2 : vector<768x128xf32> to vector<768x128xbf16>
    %cst = arith.constant dense<0.000000e+00> : vector<4x128xf32>
    %5 = tpu.matmul %3, %4, %cst {dimension_numbers = #tpu.dot_dimension_numbers<[1], [0], [0], [1], [0, 0, 1, 1], [], []>} : vector<4x768xbf16>, vector<768x128xbf16>, vector<4x128xf32> -> vector<4x128xf32>
    %c0_4 = arith.constant 0 : index
    %c0_5 = arith.constant 0 : index
    %6 = vector.load %arg3[%c0_4, %c0_5] : memref<1x128xf32, #tpu.memory_space<vmem>>, vector<1x128xf32>
    %7 = vector.broadcast %6 : vector<1x128xf32> to vector<4x128xf32>
    %8 = arith.addf %5, %7 : vector<4x128xf32>
    %c0_6 = arith.constant 0 : index
    %c0_7 = arith.constant 0 : index
    %9 = vector.load %arg4[%c0_6, %c0_7] : memref<1x128xf32, #tpu.memory_space<vmem>>, vector<1x128xf32>
    %c0_8 = arith.constant 0 : index
    %c0_9 = arith.constant 0 : index
    %10 = vector.load %arg5[%c0_8, %c0_9] : memref<5x128xf32, #tpu.memory_space<vmem>>, vector<1x128xf32>
    %11 = arith.addf %9, %10 : vector<1x128xf32>
    %c0_10 = arith.constant 0 : index
    %c0_11 = arith.constant 0 : index
    %c0_12 = arith.constant 0 : index
    %12 = vector.load %arg6[%c0_10, %c0_11, %c0_12] : memref<1x5x128xf32, #tpu.memory_space<vmem>>, vector<1x1x128xf32>
    %13 = vector.shape_cast %12 : vector<1x1x128xf32> to vector<1x128xf32>
    %14 = vector.shape_cast %11 : vector<1x128xf32> to vector<1x1x128xf32>
    tpu.vector_store %arg6[%c0_10, %c0_11, %c0_12], %14 {strides = array<i32>} : memref<1x5x128xf32, #tpu.memory_space<vmem>>, vector<1x1x128xf32>,
    %c1 = arith.constant 1 : index
    %c0_13 = arith.constant 0 : index
    %15 = vector.load %arg5[%c1, %c0_13] : memref<5x128xf32, #tpu.memory_space<vmem>>, vector<4x128xf32>
    %16 = arith.addf %8, %15 : vector<4x128xf32>
    %c0_14 = arith.constant 0 : index
    %c1_15 = arith.constant 1 : index
    %c0_16 = arith.constant 0 : index
    %17 = vector.load %arg6[%c0_14, %c1_15, %c0_16] : memref<1x5x128xf32, #tpu.memory_space<vmem>>, vector<1x4x128xf32>
    %18 = vector.shape_cast %17 : vector<1x4x128xf32> to vector<4x128xf32>
    %19 = vector.shape_cast %16 : vector<4x128xf32> to vector<1x4x128xf32>
    tpu.vector_store %arg6[%c0_14, %c1_15, %c0_16], %19 {strides = array<i32>} : memref<1x5x128xf32, #tpu.memory_space<vmem>>, vector<1x4x128xf32>,
    return
  }
  func.func @transform_0(%arg0: i32) -> (i32, i32, i32) {
    %c0_i32 = arith.constant 0 : i32
    %c0_i32_0 = arith.constant 0 : i32
    %c0_i32_1 = arith.constant 0 : i32
    return %arg0, %c0_i32, %c0_i32_0 : i32, i32, i32
  }
  func.func @transform_1(%arg0: i32) -> (i32, i32) {
    %c0_i32 = arith.constant 0 : i32
    %c0_i32_0 = arith.constant 0 : i32
    %c0_i32_1 = arith.constant 0 : i32
    return %c0_i32, %c0_i32_0 : i32, i32
  }
  func.func @transform_2(%arg0: i32) -> (i32, i32) {
    %c0_i32 = arith.constant 0 : i32
    %c0_i32_0 = arith.constant 0 : i32
    %c0_i32_1 = arith.constant 0 : i32
    return %c0_i32, %c0_i32_0 : i32, i32
  }
  func.func @transform_3(%arg0: i32) -> (i32, i32) {
    %c0_i32 = arith.constant 0 : i32
    %c0_i32_0 = arith.constant 0 : i32
    %c0_i32_1 = arith.constant 0 : i32
    return %c0_i32, %c0_i32_0 : i32, i32
  }
  func.func @transform_4(%arg0: i32) -> (i32, i32) {
    %c0_i32 = arith.constant 0 : i32
    %c0_i32_0 = arith.constant 0 : i32
    %c0_i32_1 = arith.constant 0 : i32
    return %c0_i32, %c0_i32_0 : i32, i32
  }
  func.func @transform_5(%arg0: i32) -> (i32, i32, i32) {
    %c0_i32 = arith.constant 0 : i32
    %c0_i32_0 = arith.constant 0 : i32
    %c0_i32_1 = arith.constant 0 : i32
    return %arg0, %c0_i32, %c0_i32_0 : i32, i32, i32
  }
}

</mosaic_0001>

<bundles_post_ra>
// kernel: tpu_custom_call.1
= control target key start
LH: loop header
LB: loop body
LE: loop exit
PB: predicated region body
PF: predicated region fallthrough
CT: control target
= control target key end

     0   :  { %10 = vsyncpa [#allocation3], 0  ;;  %s1057_s0 = inlined_call_operand.hbm [shape: f32[2,4,768], index: 0, kind: input, shape index: {}]   ;;  %s1058_s1 = inlined_call_operand.hbm [shape: f32[768,128], index: 1, kind: input, shape index: {}]   ;;  %s1059_s2 = inlined_call_operand.vmem [shape: f32[1,128], index: 2, kind: input, shape index: {}]   ;;  %s1060_s3 = inlined_call_operand.vmem [shape: f32[1,128], index: 3, kind: input, shape index: {}]   ;;  %s1061_s4 = inlined_call_operand.vmem [shape: f32[5,128], index: 4, kind: input, shape index: {}]   ;;  %s1062_s5 = inlined_call_operand.vmem [shape: f32[2,5,128], index: 5, kind: output, shape index: {}]  }
   0x1   :  { %12 = vsyncpa [#allocation3 + $0x1], 0 }
   0x2   :  { %13 = vsyncpa [#allocation5], 0  ;;  %s895_s18 = smov 0   ;;  %s897_s19 = smov 0  }
   0x3   :  { %s899_s20 = smov 0   ;;  %s901_s21 = smov 0  }
   0x4 LB: > { %s914_s22 = sadd.s32 4294967295, %s859_s21   ;;  %p39_p0 = scmp.ne.s32.totalorder %s851_s19, %s847_s18  ;;  %s859_s21 = sphi %s901_s21, %s1078_s21   ;;  %s855_s20 = sphi %s899_s20, %s1077_s20   ;;  %s851_s19 = sphi %s897_s19, %s1076_s19   ;;  %s847_s18 = sphi %s895_s18, %s1075_s18  }
   0x5   : > { %p1063_p1 = scmp.eq.s32.totalorder %s914_s22, 0  ;;  %p629_p2 = scmp.ge.s32.totalorder %s859_s21, 1 }
   0x6   : > { %p160_p3 = scmp.lt.s32.totalorder %s859_s21, 3  ;;  %s861_s25 = smov [#allocation4]  }
   0x7   : > { %p922_p4 = por %p1063_p1, %p39_p0  ;;  %s172_s26 = sshll.u32 %s861_s25, 4  ;;  %s173_s26 = int_to_ptr.vmem [resolvable:$true] %s172_s26 }
   0x8   : > { %p926_p5 = pnand %p629_p2, %p160_p3  ;;  %s939_s28 = sadd.s32 1, %s859_s21  }
   0x9   : > { %s1066_s23 = scalar_select %p922_p4, 1, 0 }
   0xa   : > { %s1067_s24 = scalar_select %p926_p5, 1, 0 }
   0xb   : > { %p714_p6 = pneg %p926_p5  ;;  %s26_s29 = sadd.s32 1, %s855_s20 }
   0xc   : > { %s23_s30 = ssub.s32 %s859_s21, %s939_s28  ;;  %s763_s8 = scalar_lea.hbm %s1058_s1, 12288 }
   0xd   : > { %p934_p7 = pnand %p714_p6, %p1063_p1  ;;  %p764_p8 = scmp.ne.s32.totalorder %s1058_s1, %s763_s8 }
   0xe   : > { %p770_p12 = scmp.lt.u32.totalorder %s763_s8, %s1058_s1 }
   0xf   : > { %p765_p9 = pneg %p934_p7 }
  0x11   : > { %p766_p10 = pnand %p765_p9, %p764_p8 }
  0x13   : > { %p767_p11 = pneg %p766_p10 }
  0x15   : > { %p772_p13 = pnand %p770_p12, %p767_p11 }
  0x17   : > { %775 = shalt.err (!%p772_p13)
}
  0x18   : > { %s776_s13 = scalar_lea.vmem %s173_s26, 12288  ;;  %p784_p6 = scmp.lt.s32.totalorder %s173_s26, %s173_s26 }
  0x19   : > { %p777_p0 = scmp.ne.s32.totalorder %s173_s26, %s776_s13  ;;  %p785_p1 = scmp.lt.s32.totalorder %s776_s13, %s776_s13 }
  0x1b   : > { %p779_p2 = pnand %p777_p0, %p765_p9  ;;  %p786_p4 = por %p785_p1, %p784_p6 }
  0x1d   : > { %p780_p3 = pneg %p779_p2 }
  0x1f   : > { %p787_p5 = pnand %p786_p4, %p780_p3 }
  0x21   : > { %790 = shalt.err (!%p787_p5)
}
  0x22   : > { %s862_s14 = smov 128   ;;  %s863_s15 = smov 8  }
  0x23   : > { %717 = dma.hbm_to_vmem [thread:$0]  (!%p934_p7), %s1058_s1, 12288, %s173_s26, [#allocation5], %s862_s14, %s862_s14, %s863_s15  }
  0x24   : > { %p24_p8 = scmp.eq.s32.totalorder %s23_s30, 0  ;;  %p33_p9 = scmp.ne.s32.totalorder %s855_s20, %s851_s19 }
  0x25   : > { %p34_p1 = scmp.eq.s32.totalorder %s859_s21, 0  ;;  %p723_p4 = scmp.lt.s32.totalorder %s859_s21, 2 }
  0x26   : > { %s965_s18 = scalar_select %p24_p8, %s855_s20, %s26_s29  }
  0x27   : > { %p35_p5 = por %p34_p1, %p33_p9  ;;  %s195_s25 = sand.u32 1, %s855_s20  }
  0x28   : > { %s705_s6 = smul.u32 24, %s195_s25  ;;  %s796_s13 = scalar_lea.hbm %s1057_s0, 768 }
  0x29   : > { %s706_s7 = smul.u32 384, %s859_s21  ;;  %p969_p10 = pnand %p723_p4, %p35_p5 }
  0x2a   : > { %s199_s29 = scalar_lea.vmem [#allocation2], %s705_s6  ;;  %s196_s21 = scalar_lea.sflag [#allocation3], %s195_s25 }
  0x2b   : > { %s976_s26 = scalar_lea.hbm %s1057_s0, %s706_s7  ;;  %s207_s30 = sshll.u32 %s199_s29, 4  ;;  %s978_s30 = int_to_ptr.vmem [resolvable:$true] %s207_s30 }
  0x2c   : > { %s791_s10 = scalar_lea.hbm %s976_s26, 384  ;;  %p793_p11 = pneg %p969_p10 }
  0x2d   : > { %p792_p7 = scmp.ne.s32.totalorder %s976_s26, %s791_s10  ;;  %p797_p0 = scmp.lt.u32.totalorder %s976_s26, %s1057_s0 }
  0x2e   : > { %p798_p2 = scmp.lt.u32.totalorder %s796_s13, %s791_s10  ;;  %p800_p6 = scmp.lt.u32.totalorder %s791_s10, %s976_s26 }
  0x2f   : > { %p794_p12 = pnand %p793_p11, %p792_p7 }
  0x30   : > { %p799_p3 = por %p798_p2, %p797_p0 }
  0x31   : > { %p795_p13 = pneg %p794_p12 }
  0x32   : > { %p801_p8 = por %p800_p6, %p799_p3 }
  0x34   : > { %p802_p9 = pnand %p801_p8, %p795_p13 }
  0x36   : > { %805 = shalt.err (!%p802_p9)
}
  0x37   : > { %s806_s16 = scalar_lea.vmem %s978_s30, 384  ;;  %s864_s17 = smov [#allocation2]  }
  0x38   : > { %p807_p1 = scmp.ne.s32.totalorder %s978_s30, %s806_s16  ;;  %s811_s25 = sshll.u32 %s864_s17, 4  ;;  %s812_s25 = int_to_ptr.vmem [resolvable:$false] %s811_s25 }
  0x39   : > { %s813_s6 = scalar_lea.vmem %s812_s25, 768  ;;  %p814_p7 = scmp.lt.s32.totalorder %s978_s30, %s812_s25 }
  0x3a   : > { %p809_p4 = pnand %p807_p1, %p793_p11  ;;  %p815_p12 = scmp.lt.s32.totalorder %s813_s6, %s806_s16 }
  0x3c   : > { %p810_p5 = pneg %p809_p4  ;;  %p816_p0 = por %p815_p12, %p814_p7 }
  0x3e   : > { %p817_p2 = pnand %p816_p0, %p810_p5 }
  0x40   : > { %820 = shalt.err (!%p817_p2)
}
  0x41   : > { %721 = dma.hbm_to_vmem [thread:$0]  (!%p969_p10), %s976_s26, 384, %s978_s30, %s196_s21  }
  0x42   : > { %p1070_p13 = scmp.ne.s32.totalorder %s1067_s24, 0 }
  0x43   : > { %s218_s7 = sand.u32 (!%p1070_p13), 1, %s851_s19   ;;  %p1071_p11 = scmp.ne.s32.totalorder (!%p1070_p13), %s1066_s23, 0 }
  0x44   : > { %216 = sbr.rel (%p1070_p13) target bundleno = 366 (0x16e), region = 40  ;;  %s219_s27 = scalar_lea.sflag (!%p1070_p13), [#allocation3], %s218_s7 }
  0x45   : > { %s707_s9 = smul.u32 (!%p1070_p13), 24, %s218_s7 }
  0x47   : > { %s1008_s29 = scalar_lea.vmem (!%p1070_p13), [#allocation2], %s707_s9 }
  0x4b   : > { %838 = dma.done.wait (%p1071_p11), %s219_s27, 384  }
  0x4c   : > { %840 = vsyncadd (%p1071_p11), %s219_s27, 4294966912  ;;  %p1072_p3 = scmp.eq.s32.totalorder %s914_s22, 0 }
  0x4e   : > { %842 = dma.done.wait (%p1072_p3), [#allocation5], 12288   ;;  %p1073_p10 = pmov %p1072_p3 }
  0x4f   : > { %v276_v0 = vld [vmem:[#allocation4 + $0x80] sm:$0xff]  ;;  %v277_v1 = vld [vmem:[#allocation4 + $0x88] sm:$0xff]  ;;  %v278_v11 = vld [vmem:[#allocation4 + $0x90] sm:$0xff]  ;;  %p252_p6 = scmp.lt.s32.totalorder %s914_s22, 1 }
  0x50   : > { %844 = vsyncadd (%p1073_p10), [#allocation5], 4294955008  ;;  %v260_v2 = vld [vmem:[#allocation4] sm:$0xff]  ;;  %v379_v3 = vpack.c.bf16 %v277_v1, %v276_v0  ;;  %v261_v4 = vld [vmem:[#allocation4 + $0x8] sm:$0xff] }
  0x51   : > { %v308_v5 = vld [vmem:[#allocation4 + $0x180] sm:$0xff]  ;;  %v309_v6 = vld [vmem:[#allocation4 + $0x188] sm:$0xff]  ;;  %v371_v7 = vpack.c.bf16 %v261_v4, %v260_v2  ;;  %v279_v13 = vld [vmem:[#allocation4 + $0x98] sm:$0xff]  ;;  %s1080_s22 = smov (!%p252_p6, %s914_s22), 1 }
  0x52   : > { %v395_v8 = vpack.c.bf16 %v309_v6, %v308_v5  ;;  %v292_v9 = vld [vmem:[#allocation4 + $0x100] sm:$0xff]  ;;  %v293_v10 = vld [vmem:[#allocation4 + $0x108] sm:$0xff]  ;;  %639 = vmatprep.subr.bf16.mxu0 %v379_v3  ;;  %v262_v14 = vld [vmem:[#allocation4 + $0x10] sm:$0xff]  ;;  %v380_v16 = vpack.c.bf16 %v279_v13, %v278_v11  ;;  %s635_s23 = sshll.u32 %s1080_s22, 3 }
  0x53   : > { %v387_v12 = vpack.c.bf16 %v293_v10, %v292_v9  ;;  %v263_v15 = vld [vmem:[#allocation4 + $0x18] sm:$0xff]  ;;  %640 = vmatpush3.bf16.msra.mxu0 %v371_v7  ;;  %v310_v18 = vld [vmem:[#allocation4 + $0x190] sm:$0xff]  ;;  %v280_v23 = vld [vmem:[#allocation4 + $0xa0] sm:$0xff]  ;;  %s255_s11 = scalar_lea.vmem %s1062_s5, %s635_s23 }
  0x54   : > { %661 = vmatprep.subr.bf16.mxu1 %v395_v8  ;;  %v372_v17 = vpack.c.bf16 %v263_v15, %v262_v14  ;;  %v311_v19 = vld [vmem:[#allocation4 + $0x198] sm:$0xff]  ;;  %v294_v20 = vld [vmem:[#allocation4 + $0x110] sm:$0xff]  ;;  %v281_v24 = vld [vmem:[#allocation4 + $0xa8] sm:$0xff]  ;;  %641 = vmatprep.subr.bf16.mxu0 %v380_v16 }
  0x55   : > { %662 = vmatpush3.bf16.msra.mxu1 %v387_v12  ;;  %v396_v21 = vpack.c.bf16 %v311_v19, %v310_v18  ;;  %v295_v22 = vld [vmem:[#allocation4 + $0x118] sm:$0xff]  ;;  %v381_v26 = vpack.c.bf16 %v281_v24, %v280_v23  ;;  %v264_v27 = vld [vmem:[#allocation4 + $0x20] sm:$0xff]  ;;  %v265_v28 = vld [vmem:[#allocation4 + $0x28] sm:$0xff] }
  0x56   : > { %v388_v25 = vpack.c.bf16 %v295_v22, %v294_v20  ;;  %v312_v29 = vld [vmem:[#allocation4 + $0x1a0] sm:$0xff]  ;;  %v313_v30 = vld [vmem:[#allocation4 + $0x1a8] sm:$0xff]  ;;  %v373_v33 = vpack.c.bf16 %v265_v28, %v264_v27  ;;  %v282_v35 = vld [vmem:[#allocation4 + $0xb0] sm:$0xff] }
  0x57   : > { %663 = vmatprep.subr.bf16.mxu1 %v396_v21  ;;  %v296_v31 = vld [vmem:[#allocation4 + $0x120] sm:$0xff]  ;;  %v297_v32 = vld [vmem:[#allocation4 + $0x128] sm:$0xff]  ;;  %642 = vmatpush3.bf16.msra.mxu0 %v372_v17  ;;  %v397_v34 = vpack.c.bf16 %v313_v30, %v312_v29  ;;  %v283_v36 = vld [vmem:[#allocation4 + $0xb8] sm:$0xff] }
  0x58   : > { %v266_v37 = vld [vmem:[#allocation4 + $0x30] sm:$0xff]  ;;  %643 = vmatprep.subr.bf16.mxu0 %v381_v26  ;;  %v389_v38 = vpack.c.bf16 %v297_v32, %v296_v31  ;;  %v382_v39 = vpack.c.bf16 %v283_v36, %v282_v35  ;;  %v267_v40 = vld [vmem:[#allocation4 + $0x38] sm:$0xff]  ;;  %v284_v46 = vld [vmem:[#allocation4 + $0xc0] sm:$0xff] }
  0x59   : > { %664 = vmatpush3.bf16.msra.mxu1 %v388_v25  ;;  %v314_v41 = vld [vmem:[#allocation4 + $0x1b0] sm:$0xff]  ;;  %v315_v42 = vld [vmem:[#allocation4 + $0x1b8] sm:$0xff]  ;;  %v285_v47 = vld [vmem:[#allocation4 + $0xc8] sm:$0xff]  ;;  %v374_v48 = vpack.c.bf16 %v267_v40, %v266_v37 }
  0x5a   : > { %665 = vmatprep.subr.bf16.mxu1 %v397_v34  ;;  %v398_v43 = vpack.c.bf16 %v315_v42, %v314_v41  ;;  %v298_v44 = vld [vmem:[#allocation4 + $0x130] sm:$0xff]  ;;  %v299_v45 = vld [vmem:[#allocation4 + $0x138] sm:$0xff]  ;;  %v316_v49 = vld [vmem:[#allocation4 + $0x1c0] sm:$0xff]  ;;  %v383_v52 = vpack.c.bf16 %v285_v47, %v284_v46 }
  0x5b   : > { %644 = vmatpush3.bf16.msra.mxu0 %v373_v33  ;;  %v317_v50 = vld [vmem:[#allocation4 + $0x1c8] sm:$0xff]  ;;  %v390_v51 = vpack.c.bf16 %v299_v45, %v298_v44  ;;  %v268_v53 = vld [vmem:[#allocation4 + $0x40] sm:$0xff]  ;;  %v286_v58 = vld [vmem:[#allocation4 + $0xd0] sm:$0xff] }
  0x5c   : > { %645 = vmatprep.subr.bf16.mxu0 %v382_v39  ;;  %v269_v54 = vld [vmem:[#allocation4 + $0x48] sm:$0xff]  ;;  %v300_v55 = vld [vmem:[#allocation4 + $0x140] sm:$0xff]  ;;  %v399_v56 = vpack.c.bf16 %v317_v50, %v316_v49  ;;  %v287_v59 = vld [vmem:[#allocation4 + $0xd8] sm:$0xff] }
  0x5d   : > { %666 = vmatpush3.bf16.msra.mxu1 %v389_v38  ;;  %v301_v57 = vld [vmem:[#allocation4 + $0x148] sm:$0xff]  ;;  %v318_v60 = vld [vmem:[#allocation4 + $0x1d0] sm:$0xff]  ;;  %v319_v61 = vld [vmem:[#allocation4 + $0x1d8] sm:$0xff]  ;;  %v375_v62 = vpack.c.bf16 %v269_v54, %v268_v53  ;;  %v384_v0 = vpack.c.bf16 %v287_v59, %v286_v58 }
  0x5e   : > { %667 = vmatprep.subr.bf16.mxu1 %v398_v43  ;;  %v391_v63 = vpack.c.bf16 %v301_v57, %v300_v55  ;;  %v270_v1 = vld [vmem:[#allocation4 + $0x50] sm:$0xff]  ;;  %v271_v2 = vld [vmem:[#allocation4 + $0x58] sm:$0xff]  ;;  %v400_v4 = vpack.c.bf16 %v319_v61, %v318_v60  ;;  %v288_v6 = vld [vmem:[#allocation4 + $0xe0] sm:$0xff] }
  0x5f   : > { %646 = vmatpush3.bf16.msra.mxu0 %v374_v48  ;;  %v302_v3 = vld [vmem:[#allocation4 + $0x150] sm:$0xff]  ;;  %v303_v5 = vld [vmem:[#allocation4 + $0x158] sm:$0xff]  ;;  %v289_v7 = vld [vmem:[#allocation4 + $0xe8] sm:$0xff]  ;;  %v376_v10 = vpack.c.bf16 %v271_v2, %v270_v1 }
  0x60   : > { %647 = vmatprep.subr.bf16.mxu0 %v383_v52  ;;  %v320_v8 = vld [vmem:[#allocation4 + $0x1e0] sm:$0xff]  ;;  %v321_v9 = vld [vmem:[#allocation4 + $0x1e8] sm:$0xff]  ;;  %v392_v13 = vpack.c.bf16 %v303_v5, %v302_v3  ;;  %v385_v14 = vpack.c.bf16 %v289_v7, %v288_v6  ;;  %v290_v20 = vld [vmem:[#allocation4 + $0xf0] sm:$0xff] }
  0x61   : > { %668 = vmatpush3.bf16.msra.mxu1 %v390_v51  ;;  %v272_v11 = vld [vmem:[#allocation4 + $0x60] sm:$0xff]  ;;  %v257_v12 = vld [vmem:[%s1008_s29] sm:$0xff]  ;;  %v401_v19 = vpack.c.bf16 %v321_v9, %v320_v8  ;;  %v291_v21 = vld [vmem:[#allocation4 + $0xf8] sm:$0xff] }
  0x62   : > { %669 = vmatprep.subr.bf16.mxu1 %v399_v56  ;;  %v273_v15 = vld [vmem:[#allocation4 + $0x68] sm:$0xff]  ;;  %v304_v16 = vld [vmem:[#allocation4 + $0x160] sm:$0xff]  ;;  %v359_v18 = vcombine.high %v257_v12, %v257_v12  ;;  %v258_v22 = vld [vmem:[%s1008_s29 + $0x8] sm:$0xff]  ;;  %v386_v29 = vpack.c.bf16 %v291_v21, %v290_v20  ;;  %v365_v45 = vpack.c.bf16 %v257_v12, %v257_v12 }
  0x63   : > { %648 = vmatpush3.bf16.msra.mxu0 %v375_v62  ;;  %v305_v17 = vld [vmem:[#allocation4 + $0x168] sm:$0xff]  ;;  %v322_v23 = vld [vmem:[#allocation4 + $0x1f0] sm:$0xff]  ;;  %v323_v24 = vld [vmem:[#allocation4 + $0x1f8] sm:$0xff]  ;;  %v360_v26 = vcombine.high %v258_v22, %v258_v22  ;;  %v377_v27 = vpack.c.bf16 %v273_v15, %v272_v11  ;;  %v367_v46 = vpack.c.bf16 %v258_v22, %v258_v22 }
  0x64   : > { %649 = vmatprep.subr.bf16.mxu0 %v384_v0  ;;  %v366_v25 = vpack.c.bf16 %v359_v18, %v359_v18  ;;  %v393_v28 = vpack.c.bf16 %v305_v17, %v304_v16  ;;  %v274_v30 = vld [vmem:[#allocation4 + $0x70] sm:$0xff]  ;;  %v275_v31 = vld [vmem:[#allocation4 + $0x78] sm:$0xff]  ;;  %v402_v34 = vpack.c.bf16 %v323_v24, %v322_v23  ;;  %v340_v36 = vld [vmem:[#allocation4 + $0x280] sm:$0xff] }
  0x65   : > { %670 = vmatpush3.bf16.msra.mxu1 %v391_v63  ;;  %v306_v32 = vld [vmem:[#allocation4 + $0x170] sm:$0xff]  ;;  %v368_v33 = vpack.c.bf16 %v360_v26, %v360_v26  ;;  %v307_v35 = vld [vmem:[#allocation4 + $0x178] sm:$0xff]  ;;  %v341_v37 = vld [vmem:[#allocation4 + $0x288] sm:$0xff]  ;;  %v378_v38 = vpack.c.bf16 %v275_v31, %v274_v30 }
  0x66   : > { %671 = vmatprep.subr.bf16.mxu1 %v400_v4  ;;  %458 = vmatprep.mubr.bf16.mxu0 %v366_v25  ;;  %v394_v39 = vpack.c.bf16 %v307_v35, %v306_v32  ;;  %v411_v40 = vpack.c.bf16 %v341_v37, %v340_v36  ;;  %v324_v41 = vld [vmem:[#allocation4 + $0x200] sm:$0xff]  ;;  %v325_v42 = vld [vmem:[#allocation4 + $0x208] sm:$0xff]  ;;  %v342_v43 = vld [vmem:[#allocation4 + $0x290] sm:$0xff] }
  0x67   : > { %650 = vmatpush3.bf16.msra.mxu0 %v376_v10  ;;  %498 = vmatprep.mubr.bf16.mxu1 %v368_v33  ;;  %v343_v44 = vld [vmem:[#allocation4 + $0x298] sm:$0xff]  ;;  %v403_v47 = vpack.c.bf16 %v325_v42, %v324_v41  ;;  %v326_v50 = vld [vmem:[#allocation4 + $0x210] sm:$0xff]  ;;  %v344_v53 = vld [vmem:[#allocation4 + $0x2a0] sm:$0xff] }
  0x68   : > { %651 = vmatprep.subr.bf16.mxu0 %v385_v14  ;;  %v1021_v48 = vld [vmem:[%s1008_s29 + $0x10] sm:$0xff]  ;;  %v412_v49 = vpack.c.bf16 %v343_v44, %v342_v43  ;;  %v345_v54 = vld [vmem:[#allocation4 + $0x2a8] sm:$0xff]  ;;  %v346_v60 = vld [vmem:[#allocation4 + $0x2b0] sm:$0xff] }
  0x69   : > { %672 = vmatpush3.bf16.msra.mxu1 %v392_v13  ;;  %v327_v51 = vld [vmem:[#allocation4 + $0x218] sm:$0xff]  ;;  %v361_v52 = vcombine.high %v1021_v48, %v1021_v48  ;;  %v413_v57 = vpack.c.bf16 %v345_v54, %v344_v53  ;;  %v328_v58 = vld [vmem:[#allocation4 + $0x220] sm:$0xff]  ;;  %v329_v59 = vld [vmem:[#allocation4 + $0x228] sm:$0xff] }
  0x6a   : > { %673 = vmatprep.subr.bf16.mxu1 %v401_v19  ;;  %v404_v56 = vpack.c.bf16 %v327_v51, %v326_v50  ;;  %v347_v61 = vld [vmem:[#allocation4 + $0x2b8] sm:$0xff]  ;;  %v405_v62 = vpack.c.bf16 %v329_v59, %v328_v58  ;;  %v330_v0 = vld [vmem:[#allocation4 + $0x230] sm:$0xff]  ;;  %v348_v2 = vld [vmem:[#allocation4 + $0x2c0] sm:$0xff] }
  0x6b   : > { %652 = vmatpush3.bf16.msra.mxu0 %v377_v27  ;;  %v370_v55 = vpack.c.bf16 %v361_v52, %v361_v52  ;;  %v414_v63 = vpack.c.bf16 %v347_v61, %v346_v60  ;;  %v331_v1 = vld [vmem:[#allocation4 + $0x238] sm:$0xff]  ;;  %v349_v3 = vld [vmem:[#allocation4 + $0x2c8] sm:$0xff]  ;;  %v332_v6 = vld [vmem:[#allocation4 + $0x240] sm:$0xff]  ;;  %v369_v27 = vpack.c.bf16 %v1021_v48, %v1021_v48 }
  0x6c   : > { %653 = vmatprep.subr.bf16.mxu0 %v386_v29  ;;  %v406_v4 = vpack.c.bf16 %v331_v1, %v330_v0  ;;  %v415_v5 = vpack.c.bf16 %v349_v3, %v348_v2  ;;  %v333_v7 = vld [vmem:[#allocation4 + $0x248] sm:$0xff]  ;;  %v350_v8 = vld [vmem:[#allocation4 + $0x2d0] sm:$0xff]  ;;  %v351_v9 = vld [vmem:[#allocation4 + $0x2d8] sm:$0xff] }
  0x6d   : > { %674 = vmatpush3.bf16.msra.mxu1 %v393_v28  ;;  %v407_v10 = vpack.c.bf16 %v333_v7, %v332_v6  ;;  %v416_v11 = vpack.c.bf16 %v351_v9, %v350_v8  ;;  %v334_v12 = vld [vmem:[#allocation4 + $0x250] sm:$0xff]  ;;  %v335_v13 = vld [vmem:[#allocation4 + $0x258] sm:$0xff]  ;;  %v352_v14 = vld [vmem:[#allocation4 + $0x2e0] sm:$0xff] }
  0x6e   : > { %675 = vmatprep.subr.bf16.mxu1 %v402_v34  ;;  %v353_v15 = vld [vmem:[#allocation4 + $0x2e8] sm:$0xff]  ;;  %v408_v16 = vpack.c.bf16 %v335_v13, %v334_v12  ;;  %v336_v18 = vld [vmem:[#allocation4 + $0x260] sm:$0xff]  ;;  %v354_v20 = vld [vmem:[#allocation4 + $0x2f0] sm:$0xff] }
  0x6f   : > { %654 = vmatpush3.bf16.msra.mxu0 %v378_v38  ;;  %v417_v17 = vpack.c.bf16 %v353_v15, %v352_v14  ;;  %v337_v19 = vld [vmem:[#allocation4 + $0x268] sm:$0xff]  ;;  %v355_v21 = vld [vmem:[#allocation4 + $0x2f8] sm:$0xff]  ;;  %v338_v24 = vld [vmem:[#allocation4 + $0x270] sm:$0xff] }
  0x70   : > { %683 = vmatprep.subr.bf16.mxu0 %v411_v40  ;;  %v409_v22 = vpack.c.bf16 %v337_v19, %v336_v18  ;;  %v418_v23 = vpack.c.bf16 %v355_v21, %v354_v20  ;;  %v339_v25 = vld [vmem:[#allocation4 + $0x278] sm:$0xff]  ;;  %v546_v28 = vld [vmem:[%s1060_s3] sm:$0x1]  ;;  %v550_v48 = vld [vmem:[%s1061_s4 + $0x1] sm:$0xf] }
  0x71   : > { %676 = vmatpush3.bf16.msra.mxu1 %v394_v39  ;;  %v410_v26 = vpack.c.bf16 %v339_v25, %v338_v24  ;;  %v547_v29 = vld [vmem:[%s1061_s4] sm:$0x1] }
  0x72   : > { %459 = vmatmul.mubr.bf16.vlgmr.msra.gmra.mrb[0].mxu0 %v365_v45  ;;  %v548_v30 = vadd.f32 %v547_v29, %v546_v28  ;;  %v636_v32 = vld [vmem:[%s1059_s2] ss:$0 sm:$0xff] }
  0x73   : > { %684 = vmatpush3.bf16.msra.mxu0 %v403_v47  ;;  %538 = vmatprep.mubr.bf16.mxu0 %v370_v55 }
  0x74   : > { %499 = vmatmul.mubr.bf16.vlgmr.msra.gmra.mrb[0].mxu1 %v367_v46  ;;  %685 = vmatprep.subr.bf16.mxu0 %v412_v49  ;;  %549 = vst [vmem:[%s255_s11] sm:$0x1] %v548_v30 }
  0x77   : > { %686 = vmatpush3.bf16.msra.mxu0 %v404_v56 }
  0x78   : > { %687 = vmatprep.subr.bf16.mxu0 %v413_v57 }
  0x7b   : > { %688 = vmatpush3.bf16.msra.mxu0 %v405_v62 }
  0x7c   : > { %689 = vmatprep.subr.bf16.mxu0 %v414_v63 }
  0x7f   : > { %690 = vmatpush3.bf16.msra.mxu0 %v406_v4 }
  0x80   : > { %691 = vmatprep.subr.bf16.mxu0 %v415_v5 }
  0x83   : > { %692 = vmatpush3.bf16.msra.mxu0 %v407_v10 }
  0x84   : > { %693 = vmatprep.subr.bf16.mxu0 %v416_v11 }
  0x87   : > { %694 = vmatpush3.bf16.msra.mxu0 %v408_v16 }
  0x88   : > { %695 = vmatprep.subr.bf16.mxu0 %v417_v17 }
  0x8b   : > { %696 = vmatpush3.bf16.msra.mxu0 %v409_v22 }
  0x8c   : > { %697 = vmatprep.subr.bf16.mxu0 %v418_v23 }
  0x8f   : > { %698 = vmatpush3.bf16.msra.mxu0 %v410_v26 }
  0x92   : > { %539 = vmatmul.mubr.bf16.vlgmr.msra.gmra.mrb[4].mxu0 %v369_v27 }
 0x145   : > { %v655_v31 = vpop.f32.mrb[0].mxu0 }
 0x146   : > { %v656_v33 = vpop.f32.mrb[1].mxu0 }
 0x147   : > { %v677_v34 = vpop.f32.mrb[0].mxu1  ;;  %v657_v35 = vadd.f32 %v656_v33, %v655_v31  ;;  %v658_v36 = vpop.f32.mrb[2].mxu0 }
 0x148   : > { %v678_v37 = vpop.f32.mrb[1].mxu1  ;;  %v659_v38 = vpop.f32.mrb[3].mxu0 }
 0x149   : > { %v679_v39 = vadd.f32 %v678_v37, %v677_v34  ;;  %v680_v40 = vpop.f32.mrb[2].mxu1  ;;  %v461_v41 = vadd.f32 %v657_v35, %v636_v32 }
 0x14a   : > { %v681_v42 = vpop.f32.mrb[3].mxu1 }
 0x14b   : > { %v501_v43 = vadd.f32 %v679_v39, %v461_v41 }
 0x165   : > { %v699_v44 = vpop.f32.mrb[4].mxu0 }
 0x166   : > { %v700_v45 = vpop.f32.mrb[5].mxu0 }
 0x167   : > { %v701_v46 = vadd.f32 %v700_v45, %v699_v44  ;;  %v702_v47 = vpop.f32.mrb[6].mxu0 }
 0x168   : > { %v703_v49 = vpop.f32.mrb[7].mxu0 }
 0x169   : > { %v541_v50 = vadd.f32 %v701_v46, %v501_v43 }
 0x16b   : > { %v551_v51 = vadd.f32 %v550_v48, %v541_v50 }
 0x16d   : > { %552 = vst [vmem:[%s255_s11 + $0x1] sm:$0xf] %v551_v51 }
 0x16e PF: > { %s1074_s15 = smov %s965_s18  ;;  %p16_p8 = scmp.ge.s32.totalorder %s939_s28, 4  }
 0x16f   : > { %s1075_s18 = smov %s851_s19  ;;  %s1076_s19 = smov %s855_s20 }
 0x170   : > { %s1077_s20 = smov %s1074_s15  ;;  %s1078_s21 = smov %s939_s28 }
 0x171   :  { %18 = sbr.rel (!%p16_p8) target bundleno = 4 (0x4), region = 84 }
 0x178   :  { %572 = vsyncpa [#allocation3], 1 }
 0x179   :  { %574 = vsyncpa [#allocation3 + $0x1], 1 }
 0x17a   :  { %575 = vsyncpa [#allocation5], 1 }

</bundles_post_ra>
